<compile_context>
chip_gen: v5e
topology: v5e:2x2
jax: 0.10.0
libtpu: 0.0.40
codegen_flags: <defaults>
</compile_context>

<pallas_src>
import jax
import jax.numpy as jnp
from jax.experimental import pallas as pl
from jax.experimental.pallas import tpu as pltpu


def _round_up(n, m):
    return ((n + m - 1) // m) * m


# ---------------------------------------------------------------------------
# One-time parameter packing: concatenate + lane-pad the first-stage heads.
# ---------------------------------------------------------------------------
def pack_params(params, *, simclr=True, shift=True, joint=True):
    w_lin, b_lin = params['w_lin'], params['b_lin']
    D, C = w_lin.shape
    S = params['w_s2'].shape[1]

    Cp = _round_up(C, 128)
    Dp = _round_up(D, 128)
    SHp = 128                      # shift head has 2 outputs -> pad to 128
    Jp = _round_up(4 * C, 128)
    Sp = _round_up(S, 128)

    def pad_cols(a, width):
        return jnp.pad(a, ((0, 0), (0, width - a.shape[1])))

    w_cols = [pad_cols(w_lin, Cp)]
    b_cols = [pad_cols(b_lin, Cp)]
    if simclr:
        w_cols.append(pad_cols(params['w_s1'], Dp))
        b_cols.append(pad_cols(params['b_s1'], Dp))
    if shift:
        w_cols.append(pad_cols(params['w_sh'], SHp))
        b_cols.append(pad_cols(params['b_sh'], SHp))
    if joint:
        w_cols.append(pad_cols(params['w_jt'], Jp))
        b_cols.append(pad_cols(params['b_jt'], Jp))

    packed = dict(
        w1=jnp.concatenate(w_cols, axis=1),
        b1=jnp.concatenate(b_cols, axis=1),
    )
    if simclr:
        w_s2 = params['w_s2']
        packed['w2'] = jnp.pad(
            w_s2, ((0, Dp - w_s2.shape[0]), (0, Sp - w_s2.shape[1])))
        packed['b2'] = pad_cols(params['b_s2'], Sp)

    # TODO(synk): for mem-bound deployment on v6e/v7x, pack weights in bf16 to
    # halve HBM weight traffic (keep matmul accumulation in f32).
    packed['meta'] = dict(
        D=D, C=C, S=S, Cp=Cp, Dp=Dp, SHp=SHp, Jp=Jp, Sp=Sp,
        heads=dict(simclr=bool(simclr), shift=bool(shift), joint=bool(joint)),
    )
    return packed


# ---------------------------------------------------------------------------
# Kernel factory: specialized on (softmax, sigmoid, activation, head flags).
# ---------------------------------------------------------------------------
def _make_heads_kernel(cfg):
    (use_softmax, use_sigmoid, activation,
     has_simclr, has_shift, has_joint,
     C, Cp, Dp, SHp, Jp, Sp) = cfg

    def kernel(x_ref, w1_ref, b1_ref, *rest):
        if has_simclr:
            w2_ref, b2_ref, out_ref = rest
        else:
            (out_ref,) = rest

        x = x_ref[...]
        # Single fused first-stage matmul: fills the MXU once for all heads.
        y1 = jnp.dot(x, w1_ref[...], preferred_element_type=jnp.float32) + b1_ref[...]

        # ---------------- classification logits (+ softmax / sigmoid) -------
        logits = y1[:, :Cp]
        if use_softmax:
            col = jax.lax.broadcasted_iota(jnp.int32, logits.shape, 1)
            logits = jnp.where(col < C, logits, jnp.float32(-1e30))
            m = jnp.max(logits, axis=-1, keepdims=True)
            e = jnp.exp(logits - m)
            denom = jnp.sum(e, axis=-1, keepdims=True)
            logits = e * pl.reciprocal(denom, approx=True)   # EUP slot, ~free
        elif use_sigmoid:
            logits = jax.nn.sigmoid(logits)
        out_ref[:, :Cp] = logits.astype(out_ref.dtype)

        in_off = Cp
        out_off = Cp

        # ---------------- simclr head: act(x@W1s + b) @ W2 + b --------------
        if has_simclr:
            h = y1[:, in_off:in_off + Dp]
            in_off += Dp
            if activation == 'relu':
                h = jnp.maximum(h, 0.0)
            elif activation == 'relu6':
                h = jnp.clip(h, 0.0, 6.0)
            else:  # 'tanh'
                h = jnp.tanh(h)
            z = jnp.dot(h, w2_ref[...], preferred_element_type=jnp.float32) + b2_ref[...]
            out_ref[:, out_off:out_off + Sp] = z.astype(out_ref.dtype)
            out_off += Sp

        # ---------------- shift head ----------------------------------------
        if has_shift:
            out_ref[:, out_off:out_off + SHp] = \
                y1[:, in_off:in_off + SHp].astype(out_ref.dtype)
            in_off += SHp
            out_off += SHp

        # ---------------- joint distribution head ---------------------------
        if has_joint:
            out_ref[:, out_off:out_off + Jp] = \
                y1[:, in_off:in_off + Jp].astype(out_ref.dtype)

    return kernel


# ---------------------------------------------------------------------------
# Wrapper mimicking BaseModel.forward (features = output of penultimate()).
# ---------------------------------------------------------------------------
def base_model_forward(features, packed, *, penultimate=False, simclr=False,
                       shift=False, joint=False, softmax=False, sigmoid=False,
                       activation='relu', batch_tile=128):
    if activation not in ('relu', 'relu6', 'tanh'):
        raise ValueError(f"unsupported activation: {activation!r}")

    meta = packed['meta']
    heads = meta['heads']
    for name, requested in (('simclr', simclr), ('shift', shift), ('joint', joint)):
        if requested and not heads[name]:
            raise ValueError(
                f"head '{name}' requested but not packed; call pack_params with {name}=True")

    has_simclr, has_shift, has_joint = heads['simclr'], heads['shift'], heads['joint']
    C, D, S = meta['C'], meta['D'], meta['S']
    Cp, Dp, SHp, Jp, Sp = meta['Cp'], meta['Dp'], meta['SHp'], meta['Jp'], meta['Sp']

    B, Dx = features.shape
    if Dx != D:
        raise ValueError(f"Issue seems in last_dim: change last dim from {Dx} to {D}")

    dt = features.dtype
    N1 = packed['w1'].shape[1]
    N_out = Cp + (Sp if has_simclr else 0) + (SHp if has_shift else 0) + (Jp if has_joint else 0)

    # Batch tiling (x / output pipelined; weights stay resident in VMEM).
    TB = min(int(batch_tile), _round_up(B, 8))
    B_pad = _round_up(B, TB)
    x = features if B_pad == B else jnp.pad(features, ((0, B_pad - B), (0, 0)))

    cfg = (bool(softmax), bool(sigmoid), activation,
           has_simclr, has_shift, has_joint, C, Cp, Dp, SHp, Jp, Sp)
    kernel = _make_heads_kernel(cfg)

    args = [x, packed['w1'], packed['b1']]
    in_specs = [
        pl.BlockSpec((TB, D), lambda i: (i, 0)),
        pl.BlockSpec((D, N1), lambda i: (0, 0)),    # resident weight
        pl.BlockSpec((1, N1), lambda i: (0, 0)),    # resident bias
    ]
    if has_simclr:
        args += [packed['w2'], packed['b2']]
        in_specs += [
            pl.BlockSpec((Dp, Sp), lambda i: (0, 0)),
            pl.BlockSpec((1, Sp), lambda i: (0, 0)),
        ]

    itemsize = jnp.dtype(dt).itemsize
    weight_bytes = sum(int(a.size) * int(a.dtype.itemsize) for a in args[1:])
    x_tile = TB * D * itemsize
    o_tile = TB * N_out * itemsize
    y1_tile = TB * N1 * 4
    need = 2 * weight_bytes + 2 * (x_tile + o_tile) + 2 * y1_tile + (2 << 20)
    vmem_limit = int(min(96 * 2**20, max(need, 16 * 2**20)))

    flops = 2 * B_pad * D * N1 + (2 * B_pad * Dp * Sp if has_simclr else 0)
    transcendentals = B_pad * Cp if (softmax or sigmoid) else 0
    bytes_accessed = int(B_pad * D * itemsize + weight_bytes + B_pad * N_out * itemsize)

    slab = pl.pallas_call(
        kernel,
        grid=(B_pad // TB,),
        in_specs=in_specs,
        out_specs=pl.BlockSpec((TB, N_out), lambda i: (i, 0)),
        out_shape=jax.ShapeDtypeStruct((B_pad, N_out), dt),
        compiler_params=pltpu.CompilerParams(
            dimension_semantics=("parallel",),
            vmem_limit_bytes=vmem_limit,
        ),
        cost_estimate=pl.CostEstimate(
            flops=int(flops),
            transcendentals=int(transcendentals),
            bytes_accessed=bytes_accessed,
        ),
    )(*args)

    # Slice the lane-dense slab back into the individual heads (wrapper side).
    output = slab[:B, :C]
    off = Cp
    _aux = {}
    _return_aux = False
    if penultimate:
        _return_aux = True
        _aux['penultimate'] = features
    if has_simclr:
        if simclr:
            _return_aux = True
            _aux['simclr'] = slab[:B, off:off + S]
        off += Sp
    if has_shift:
        if shift:
            _return_aux = True
            _aux['shift'] = slab[:B, off:off + 2]
        off += SHp
    if has_joint:
        if joint:
            _return_aux = True
            _aux['joint'] = slab[:B, off:off + 4 * C]
        off += Jp
    if _return_aux:
        return output, _aux
    return output


# ---------------------------------------------------------------------------
# Deterministic parameter init (PyTorch-style uniform(-1/sqrt(fan_in), +))
# ---------------------------------------------------------------------------
def init_params(key, last_dim, num_classes, simclr_dim, dtype=jnp.float32):
    def linear(key, fan_in, fan_out):
        kw, kb = jax.random.split(key)
        bound = 1.0 / jnp.sqrt(fan_in)
        w = jax.random.uniform(kw, (fan_in, fan_out), dtype, -bound, bound)
        b = jax.random.uniform(kb, (1, fan_out), dtype, -bound, bound)
        return w, b

    keys = jax.random.split(key, 5)
    w_lin, b_lin = linear(keys[0], last_dim, num_classes)
    w_s1, b_s1 = linear(keys[1], last_dim, last_dim)
    w_s2, b_s2 = linear(keys[2], last_dim, simclr_dim)
    w_sh, b_sh = linear(keys[3], last_dim, 2)
    w_jt, b_jt = linear(keys[4], last_dim, 4 * num_classes)
    # NOTE: shift_dis head exists in __init__ but is never used in forward().
    return dict(
        w_lin=w_lin, b_lin=b_lin,
        w_s1=w_s1, b_s1=b_s1,
        w_s2=w_s2, b_s2=b_s2,
        w_sh=w_sh, b_sh=b_sh,
        w_jt=w_jt, b_jt=b_jt,
    )


# ---------------------------------------------------------------------------
# Pure-JAX reference (mirrors the PyTorch forward) for verification
# ---------------------------------------------------------------------------
def reference_forward(x, p, softmax):
    out = x @ p['w_lin'] + p['b_lin']
    if softmax:
        out = jax.nn.softmax(out, axis=-1)
    h = jnp.maximum(x @ p['w_s1'] + p['b_s1'], 0.0)
    simclr = h @ p['w_s2'] + p['b_s2']
    shift = x @ p['w_sh'] + p['b_sh']
    joint = x @ p['w_jt'] + p['b_jt']
    return out, simclr, shift, joint


if __name__ == "__main__":
    B, LAST_DIM, NUM_CLASSES, SIMCLR_DIM = 8, 32, 10, 128

    key = jax.random.PRNGKey(0)
    k_x, k_p = jax.random.split(key)
    features = jax.random.normal(k_x, (B, LAST_DIM), jnp.float32)
    params = init_params(k_p, LAST_DIM, NUM_CLASSES, SIMCLR_DIM)

    # Pack once (concat + 128-lane padding) with all auxiliary heads enabled.
    packed = pack_params(params, simclr=True, shift=True, joint=True)

    out, aux = base_model_forward(
        features, packed,
        penultimate=True, simclr=True, shift=True, joint=True,
        softmax=True, activation='relu',
    )
    jax.block_until_ready((out, aux))

    # Verify against pure-JAX reference.
    r_out, r_simclr, r_shift, r_joint = reference_forward(features, params, softmax=True)
    assert jnp.allclose(out, r_out, atol=5e-3, rtol=5e-3)      # approx reciprocal in softmax
    assert jnp.allclose(aux['simclr'], r_simclr, atol=1e-4, rtol=1e-4)
    assert jnp.allclose(aux['shift'], r_shift, atol=1e-5, rtol=1e-5)
    assert jnp.allclose(aux['joint'], r_joint, atol=1e-5, rtol=1e-5)
    assert jnp.allclose(aux['penultimate'], features)

    # Inference-only / sigmoid path: heads statically skipped at pack time.
    packed_min = pack_params(params, simclr=False, shift=False, joint=False)
    out_sig = base_model_forward(features, packed_min, sigmoid=True)
    jax.block_until_ready(out_sig)
    r_sig = jax.nn.sigmoid(features @ params['w_lin'] + params['b_lin'])
    assert jnp.allclose(out_sig, r_sig, atol=1e-5, rtol=1e-5)

    print("KERNEL_OK")
</pallas_src>

<mosaic_0001>
module attributes {stable_mosaic.version = 11 : i64} {
  func.func @kernel(%arg0: i32, %arg1: memref<8x32xf32, #tpu.memory_space<vmem>>, %arg2: memref<32x512xf32, #tpu.memory_space<vmem>>, %arg3: memref<1x512xf32, #tpu.memory_space<vmem>>, %arg4: memref<128x128xf32, #tpu.memory_space<vmem>>, %arg5: memref<1x128xf32, #tpu.memory_space<vmem>>, %arg6: memref<8x512xf32, #tpu.memory_space<vmem>>) attributes {dimension_semantics = [#tpu.dimension_semantics<parallel>], iteration_bounds = array<i64: 1>, scalar_prefetch = 0 : i64, scratch_operands = 0 : i64, tpu.core_type = #tpu.core_type<tc>, window_params = [{transform_indices = @transform_0, window_bounds = array<i64: 8, 32>}, {pipeline_mode = #tpu.pipeline_mode<synchronous>, transform_indices = @transform_1, window_bounds = array<i64: 32, 512>}, {pipeline_mode = #tpu.pipeline_mode<synchronous>, transform_indices = @transform_2, window_bounds = array<i64: 1, 512>}, {pipeline_mode = #tpu.pipeline_mode<synchronous>, transform_indices = @transform_3, window_bounds = array<i64: 128, 128>}, {pipeline_mode = #tpu.pipeline_mode<synchronous>, transform_indices = @transform_4, window_bounds = array<i64: 1, 128>}, {transform_indices = @transform_5, window_bounds = array<i64: 8, 512>}]} {
    %c0 = arith.constant 0 : index
    %c0_0 = arith.constant 0 : index
    %0 = vector.load %arg1[%c0, %c0_0] : memref<8x32xf32, #tpu.memory_space<vmem>>, vector<8x32xf32>
    %c0_1 = arith.constant 0 : index
    %c0_2 = arith.constant 0 : index
    %1 = vector.load %arg2[%c0_1, %c0_2] : memref<32x512xf32, #tpu.memory_space<vmem>>, vector<32x512xf32>
    %cst = arith.constant dense<0.000000e+00> : vector<8x512xf32>
    %2 = tpu.matmul %0, %1, %cst {dimension_numbers = #tpu.dot_dimension_numbers<[1], [0], [0], [1], [0, 0, 1, 1], [], []>} : vector<8x32xf32>, vector<32x512xf32>, vector<8x512xf32> -> vector<8x512xf32>
    %c0_3 = arith.constant 0 : index
    %c0_4 = arith.constant 0 : index
    %3 = vector.load %arg3[%c0_3, %c0_4] : memref<1x512xf32, #tpu.memory_space<vmem>>, vector<1x512xf32>
    %4 = vector.broadcast %3 : vector<1x512xf32> to vector<8x512xf32>
    %5 = arith.addf %2, %4 : vector<8x512xf32>
    %6 = vector.extract_strided_slice %5 {offsets = [0, 0], sizes = [8, 128], strides = [1, 1]} : vector<8x512xf32> to vector<8x128xf32>
    %7 = tpu.iota {dimensions = array<i32: 1>} : vector<8x128xi32>
    %c10_i32 = arith.constant 10 : i32
    %8 = vector.broadcast %c10_i32 : i32 to vector<8x128xi32>
    %9 = arith.cmpi slt, %7, %8 : vector<8x128xi32>
    %cst_5 = arith.constant -1.000000e+30 : f32
    %10 = vector.broadcast %cst_5 : f32 to vector<8x128xf32>
    %11 = arith.select %9, %6, %10 : vector<8x128xi1>, vector<8x128xf32>
    %cst_6 = arith.constant dense<0xFF800000> : vector<8xf32>
    %12 = vector.multi_reduction <maximumf>, %11, %cst_6 [1] : vector<8x128xf32> to vector<8xf32>
    %13 = vector.shape_cast %12 : vector<8xf32> to vector<8x1xf32>
    %14 = vector.broadcast %13 : vector<8x1xf32> to vector<8x128xf32>
    %15 = arith.subf %11, %14 : vector<8x128xf32>
    %16 = math.exp %15 : vector<8x128xf32>
    %cst_7 = arith.constant dense<0.000000e+00> : vector<8xf32>
    %17 = vector.multi_reduction <add>, %16, %cst_7 [1] : vector<8x128xf32> to vector<8xf32>
    %18 = vector.shape_cast %17 : vector<8xf32> to vector<8x1xf32>
    %19 = tpu.reciprocal %18 {approx = true} : vector<8x1xf32> -> vector<8x1xf32>
    %20 = vector.broadcast %19 : vector<8x1xf32> to vector<8x128xf32>
    %21 = arith.mulf %16, %20 : vector<8x128xf32>
    %c0_8 = arith.constant 0 : index
    %c0_9 = arith.constant 0 : index
    %22 = vector.load %arg6[%c0_8, %c0_9] : memref<8x512xf32, #tpu.memory_space<vmem>>, vector<8x128xf32>
    tpu.vector_store %arg6[%c0_8, %c0_9], %21 {strides = array<i32>} : memref<8x512xf32, #tpu.memory_space<vmem>>, vector<8x128xf32>,
    %23 = vector.extract_strided_slice %5 {offsets = [0, 128], sizes = [8, 128], strides = [1, 1]} : vector<8x512xf32> to vector<8x128xf32>
    %cst_10 = arith.constant 0.000000e+00 : f32
    %24 = vector.broadcast %cst_10 : f32 to vector<8x128xf32>
    %25 = arith.maximumf %23, %24 : vector<8x128xf32>
    %c0_11 = arith.constant 0 : index
    %c0_12 = arith.constant 0 : index
    %26 = vector.load %arg4[%c0_11, %c0_12] : memref<128x128xf32, #tpu.memory_space<vmem>>, vector<128x128xf32>
    %cst_13 = arith.constant dense<0.000000e+00> : vector<8x128xf32>
    %27 = tpu.matmul %25, %26, %cst_13 {dimension_numbers = #tpu.dot_dimension_numbers<[1], [0], [0], [1], [0, 0, 1, 1], [], []>} : vector<8x128xf32>, vector<128x128xf32>, vector<8x128xf32> -> vector<8x128xf32>
    %c0_14 = arith.constant 0 : index
    %c0_15 = arith.constant 0 : index
    %28 = vector.load %arg5[%c0_14, %c0_15] : memref<1x128xf32, #tpu.memory_space<vmem>>, vector<1x128xf32>
    %29 = vector.broadcast %28 : vector<1x128xf32> to vector<8x128xf32>
    %30 = arith.addf %27, %29 : vector<8x128xf32>
    %c0_16 = arith.constant 0 : index
    %c128 = arith.constant 128 : index
    %31 = vector.load %arg6[%c0_16, %c128] : memref<8x512xf32, #tpu.memory_space<vmem>>, vector<8x128xf32>
    tpu.vector_store %arg6[%c0_16, %c128], %30 {strides = array<i32>} : memref<8x512xf32, #tpu.memory_space<vmem>>, vector<8x128xf32>,
    %32 = vector.extract_strided_slice %5 {offsets = [0, 256], sizes = [8, 128], strides = [1, 1]} : vector<8x512xf32> to vector<8x128xf32>
    %c0_17 = arith.constant 0 : index
    %c256 = arith.constant 256 : index
    %33 = vector.load %arg6[%c0_17, %c256] : memref<8x512xf32, #tpu.memory_space<vmem>>, vector<8x128xf32>
    tpu.vector_store %arg6[%c0_17, %c256], %32 {strides = array<i32>} : memref<8x512xf32, #tpu.memory_space<vmem>>, vector<8x128xf32>,
    %34 = vector.extract_strided_slice %5 {offsets = [0, 384], sizes = [8, 128], strides = [1, 1]} : vector<8x512xf32> to vector<8x128xf32>
    %c0_18 = arith.constant 0 : index
    %c384 = arith.constant 384 : index
    %35 = vector.load %arg6[%c0_18, %c384] : memref<8x512xf32, #tpu.memory_space<vmem>>, vector<8x128xf32>
    tpu.vector_store %arg6[%c0_18, %c384], %34 {strides = array<i32>} : memref<8x512xf32, #tpu.memory_space<vmem>>, vector<8x128xf32>,
    return
  }
  func.func @transform_0(%arg0: i32) -> (i32, i32) {
    %c0_i32 = arith.constant 0 : i32
    %c0_i32_0 = arith.constant 0 : i32
    return %arg0, %c0_i32 : i32, i32
  }
  func.func @transform_1(%arg0: i32) -> (i32, i32) {
    %c0_i32 = arith.constant 0 : i32
    %c0_i32_0 = arith.constant 0 : i32
    %c0_i32_1 = arith.constant 0 : i32
    return %c0_i32, %c0_i32_0 : i32, i32
  }
  func.func @transform_2(%arg0: i32) -> (i32, i32) {
    %c0_i32 = arith.constant 0 : i32
    %c0_i32_0 = arith.constant 0 : i32
    %c0_i32_1 = arith.constant 0 : i32
    return %c0_i32, %c0_i32_0 : i32, i32
  }
  func.func @transform_3(%arg0: i32) -> (i32, i32) {
    %c0_i32 = arith.constant 0 : i32
    %c0_i32_0 = arith.constant 0 : i32
    %c0_i32_1 = arith.constant 0 : i32
    return %c0_i32, %c0_i32_0 : i32, i32
  }
  func.func @transform_4(%arg0: i32) -> (i32, i32) {
    %c0_i32 = arith.constant 0 : i32
    %c0_i32_0 = arith.constant 0 : i32
    %c0_i32_1 = arith.constant 0 : i32
    return %c0_i32, %c0_i32_0 : i32, i32
  }
  func.func @transform_5(%arg0: i32) -> (i32, i32) {
    %c0_i32 = arith.constant 0 : i32
    %c0_i32_0 = arith.constant 0 : i32
    return %arg0, %c0_i32 : i32, i32
  }
}

</mosaic_0001>

<bundles_post_ra>
// kernel: tpu_custom_call.1
= control target key start
LH: loop header
LB: loop body
LE: loop exit
PB: predicated region body
PF: predicated region fallthrough
CT: control target
= control target key end

     0   :  { %10 = vsyncpa [#allocation3], 0  ;;  %s481_s0 = inlined_call_operand.hbm [shape: f32[8,32], index: 0, kind: input, shape index: {}]   ;;  %s482_s1 = inlined_call_operand.hbm [shape: f32[32,512], index: 1, kind: input, shape index: {}]   ;;  %s483_s2 = inlined_call_operand.hbm [shape: f32[1,512], index: 2, kind: input, shape index: {}]   ;;  %s484_s3 = inlined_call_operand.hbm [shape: f32[128,128], index: 3, kind: input, shape index: {}]   ;;  %s485_s4 = inlined_call_operand.vmem [shape: f32[1,128], index: 4, kind: input, shape index: {}]   ;;  %s486_s5 = inlined_call_operand.hbm [shape: f32[8,512], index: 5, kind: output, shape index: {}]  }
   0x1   :  { %11 = vsyncpa [#allocation6], 0 }
   0x2   :  { %12 = vsyncpa [#allocation9], 0  ;;  %s29_s20 = sshll.u32 %s482_s1, 4  ;;  %s30_s20 = int_to_ptr.hbm [resolvable:$true] %s29_s20 }
   0x3   :  { %13 = vsyncpa [#allocation4], 0  ;;  %s414_s21 = smov [#allocation5]   ;;  %s19_s25 = sshll.u32 %s481_s0, 4  ;;  %s20_s25 = int_to_ptr.hbm [resolvable:$true] %s19_s25 }
   0x4   :  { %s31_s22 = sshll.u32 %s414_s21, 4  ;;  %s415_s26 = smov 512   ;;  %s32_s22 = int_to_ptr.vmem [resolvable:$true] %s31_s22 }
   0x5   :  { %s416_s27 = smov 32   ;;  %s417_s28 = smov [#allocation2]  }
   0x6   :  { %37 = dma.hbm_to_vmem [thread:$0]  %s30_s20, 2048, %s32_s22, [#allocation6], %s415_s26, %s415_s26, %s416_s27  }
   0x7   :  { %s21_s29 = sshll.u32 %s417_s28, 4  ;;  %s43_s7 = sshll.u32 %s483_s2, 4  ;;  %s22_s29 = int_to_ptr.vmem [resolvable:$true] %s21_s29  ;;  %s44_s7 = int_to_ptr.hbm [resolvable:$true] %s43_s7 }
   0x8   :  { %24 = dma.hbm_to_vmem [thread:$0]  %s20_s25, 128, %s22_s29, [#allocation3]  }
   0x9   :  { %s53_s9 = sshll.u32 %s484_s3, 4  ;;  %s418_s10 = smov [#allocation7]   ;;  %s54_s9 = int_to_ptr.hbm [resolvable:$true] %s53_s9 }
   0xa   :  { %s45_s11 = sshll.u32 %s418_s10, 4  ;;  %s419_s0 = smov [#allocation8]   ;;  %s46_s11 = int_to_ptr.vmem [resolvable:$true] %s45_s11 }
   0xb   :  { %48 = dma.hbm_to_vmem [thread:$0]  %s44_s7, 64, %s46_s11, [#allocation6]  }
   0xc   :  { %s55_s12 = sshll.u32 %s419_s0, 4  ;;  %s420_s13 = smov 128   ;;  %s56_s12 = int_to_ptr.vmem [resolvable:$true] %s55_s12 }
   0xd   :  { %s421_s14 = smov 8  }
   0xe   :  { %61 = dma.hbm_to_vmem [thread:$0]  %s54_s9, 2048, %s56_s12, [#allocation9], %s420_s13, %s420_s13, %s421_s14  }
   0xf   :  { %406 = dma.done.wait [#allocation3], 128  }
  0x10   :  { %407 = vsyncadd [#allocation3], 4294967168 }
  0x11   :  { %408 = dma.done.wait [#allocation6], 2112  }
  0x12   :  { %409 = vsyncadd [#allocation6], 4294965184 }
  0x13   :  { %410 = dma.done.wait [#allocation9], 2048  }
  0x14   :  { %411 = vsyncadd [#allocation9], 4294965248  ;;  %v93_v0 = vld [vmem:[#allocation5 + $0x60] sm:$0xff]  ;;  %v465_v4 = vld [vmem:[#allocation2] sm:$0xff]  ;;  %vm107_vm0 = vcmask 261120   ;;  %v191_v26 = vlaneseq  ;;  %s422_s15 = smov [#allocation10]  }
  0x15   :  { %v89_v1 = vld [vmem:[#allocation5 + $0x40] sm:$0xff]  ;;  %123 = vmatpush.msra.mxu1 %v93_v0  ;;  %v94_v5 = vld [vmem:[#allocation5 + $0x68] sm:$0xff]  ;;  %v220_v10 = vld [vmem:[#allocation8 + $0x70] sm:$0xff]  ;;  %s254_s16 = sshll.u32 %s422_s15, 4  ;;  %s256_s19 = sshll.u32 %s486_s5, 4  ;;  %s255_s16 = int_to_ptr.vmem [resolvable:$true] %s254_s16  ;;  %s257_s19 = int_to_ptr.hbm [resolvable:$true] %s256_s19 }
  0x16   :  { %v85_v2 = vld [vmem:[#allocation5 + $0x20] sm:$0xff]  ;;  %v90_v6 = vld [vmem:[#allocation5 + $0x48] sm:$0xff]  ;;  %v95_v12 = vld [vmem:[#allocation5 + $0x70] sm:$0xff]  ;;  %v192_v29 = vand.u32 127, %v191_v26 }
  0x17   :  { %124 = vmatpush.msra.mxu1 %v89_v1  ;;  %v81_v3 = vld [vmem:[#allocation5] sm:$0xff]  ;;  %v86_v7 = vld [vmem:[#allocation5 + $0x28] sm:$0xff]  ;;  %v96_v13 = vld [vmem:[#allocation5 + $0x78] sm:$0xff]  ;;  %163 = vmatpush.msra.mxu2 %v95_v12 }
  0x18   :  { %v82_v8 = vld [vmem:[#allocation5 + $0x8] sm:$0xff]  ;;  %v221_v9 = vld [vmem:[#allocation8 + $0x78] sm:$0xff]  ;;  %183 = vmatpush.msra.mxu3 %v96_v13  ;;  %v91_v15 = vld [vmem:[#allocation5 + $0x50] sm:$0xff]  ;;  %vm193_vm1 = vcmp.lt.s32.totalorder %v192_v29, 10 }
  0x19   :  { %125 = vmatpush.msra.mxu1 %v85_v2  ;;  %226 = vmatpush.msra.mxu0 %v221_v9  ;;  %v219_v11 = vld [vmem:[#allocation8 + $0x68] sm:$0xff]  ;;  %v218_v14 = vld [vmem:[#allocation8 + $0x60] sm:$0xff]  ;;  %v92_v16 = vld [vmem:[#allocation5 + $0x58] sm:$0xff] }
  0x1a   :  { %v87_v17 = vld [vmem:[#allocation5 + $0x30] sm:$0xff]  ;;  %v88_v18 = vld [vmem:[#allocation5 + $0x38] sm:$0xff]  ;;  %164 = vmatpush.msra.mxu2 %v91_v15  ;;  %184 = vmatpush.msra.mxu3 %v92_v16  ;;  %v214_v22 = vld [vmem:[#allocation8 + $0x40] sm:$0xff] }
  0x1b   :  { %126 = vmatpush.msra.mxu1 %v81_v3  ;;  %227 = vmatpush.msra.mxu0 %v220_v10  ;;  %v217_v19 = vld [vmem:[#allocation8 + $0x58] sm:$0xff]  ;;  %v216_v20 = vld [vmem:[#allocation8 + $0x50] sm:$0xff]  ;;  %v215_v21 = vld [vmem:[#allocation8 + $0x48] sm:$0xff] }
  0x1c   :  { %268 = vmatmul.msk.f32.vlgmr.msra.gmra.mxu1 %vm107_vm0, %v465_v4  ;;  %165 = vmatpush.msra.mxu2 %v87_v17  ;;  %v213_v23 = vld [vmem:[#allocation8 + $0x38] sm:$0xff]  ;;  %v212_v24 = vld [vmem:[#allocation8 + $0x30] sm:$0xff]  ;;  %v211_v25 = vld [vmem:[#allocation8 + $0x28] sm:$0xff] }
  0x1d   :  { %143 = vmatpush.msrb.mxu1 %v94_v5  ;;  %228 = vmatpush.msra.mxu0 %v219_v11  ;;  %v210_v27 = vld [vmem:[#allocation8 + $0x20] sm:$0xff]  ;;  %v97_v28 = vld [vmem:[#allocation7] sm:$0xf]  ;;  %v83_v34 = vld [vmem:[#allocation5 + $0x10] sm:$0xff] }
  0x1e   :  { %185 = vmatpush.msra.mxu3 %v88_v18  ;;  %v99_v30 = vperm.slane %v97_v28, 0  ;;  %v84_v35 = vld [vmem:[#allocation5 + $0x18] sm:$0xff]  ;;  %166 = vmatpush.msra.mxu2 %v83_v34  ;;  %v100_v37 = vperm.slane %v97_v28, 1  ;;  %v207_v41 = vld [vmem:[#allocation8 + $0x8] sm:$0xff]  ;;  %v206_v42 = vld [vmem:[#allocation8] sm:$0xff]  ;;  %v101_v48 = vperm.slane %v97_v28, 2 }
  0x1f   :  { %144 = vmatpush.msrb.mxu1 %v90_v6  ;;  %229 = vmatpush.msra.mxu0 %v218_v14  ;;  %v209_v36 = vld [vmem:[#allocation8 + $0x18] sm:$0xff]  ;;  %v208_v38 = vld [vmem:[#allocation8 + $0x10] sm:$0xff]  ;;  %v102_v49 = vperm.slane %v97_v28, 3 }
  0x20   :  { %186 = vmatpush.msra.mxu3 %v84_v35  ;;  %270 = vmatmul.msk.f32.vlgmr.msra.gmra.mxu2 %vm107_vm0, %v465_v4  ;;  %v281_v50 = vld [vmem:[%s485_s4] ss:$0 sm:$0xff] }
  0x21   :  { %145 = vmatpush.msrb.mxu1 %v86_v7  ;;  %230 = vmatpush.msra.mxu0 %v217_v19 }
  0x22   :  { %271 = vmatmul.msk.f32.vlgmr.msra.gmra.mxu3 %vm107_vm0, %v465_v4 }
  0x23   :  { %146 = vmatpush.msrb.mxu1 %v82_v8  ;;  %231 = vmatpush.msra.mxu0 %v216_v20 }
  0x24   :  { %269 = vmatmul.msk.f32.vlgmr.msrb.gmra.mxu1 %vm107_vm0, %v465_v4 }
  0x25   :  { %232 = vmatpush.msra.mxu0 %v215_v21 }
  0x27   :  { %233 = vmatpush.msra.mxu0 %v214_v22 }
  0x29   :  { %234 = vmatpush.msra.mxu0 %v213_v23 }
  0x2b   :  { %235 = vmatpush.msra.mxu0 %v212_v24 }
  0x2d   :  { %236 = vmatpush.msra.mxu0 %v211_v25 }
  0x2f   :  { %237 = vmatpush.msra.mxu0 %v210_v27 }
  0x31   :  { %238 = vmatpush.msra.mxu0 %v209_v36 }
  0x33   :  { %239 = vmatpush.msra.mxu0 %v208_v38 }
  0x35   :  { %240 = vmatpush.msra.mxu0 %v207_v41 }
  0x37   :  { %241 = vmatpush.msra.mxu0 %v206_v42 }
  0x99   :  { %v128_v31 = vpop.f32.mrf.mxu1 }
  0x9a   :  { %v129_v32 = vadd.f32 %v128_v31, %v99_v30 }
  0x9c   :  { %v194_v33 = vsel %vm193_vm1, %v129_v32, -1e+30 }
  0x9d   :  { %195 = vmax.xlane.f32.xlu0 %v194_v33 }
  0xa1   :  { %v148_v39 = vpop.f32.mrf.mxu1 }
  0xa2   :  { %v149_v40 = vadd.f32 %v148_v39, %v100_v37 }
  0xa3   :  { %v168_v51 = vpop.f32.mrf.mxu2 }
  0xa4   :  { %v205_v43 = vmax.f32 %v149_v40, 0.0  ;;  %v169_v52 = vadd.f32 %v168_v51, %v101_v48 }
  0xa5   :  { %v188_v53 = vpop.f32.mrf.mxu3 }
  0xa6   :  { %242 = vmatmul.f32.vlgmr.msra.gmra.mxu0 %v205_v43  ;;  %v189_v55 = vadd.f32 %v188_v53, %v102_v49  ;;  %247 = vst [vmem:[#allocation10 + $0x10] sm:$0xff] %v169_v52 }
  0xa8   :  { %248 = vst [vmem:[#allocation10 + $0x18] sm:$0xff] %v189_v55 }
 0x110   :  { %v196_v44 = vpop.xlane.xlu0 %195 }
 0x111   :  { %v197_v45 = vsub.f32 %v194_v33, %v196_v44 }
 0x113   :  { %v198_v46 = vmul.f32 1.442695, %v197_v45 }
 0x115   :  { %282 = vpow2.f32 %v198_v46 }
 0x11b   :  { %v283_v47 = vpop.eup %282 }
 0x11c   :  { %200 = vadd.xlane.f32.xlu0 %v283_v47 }
 0x123   :  { %v243_v54 = vpop.f32.mrf.mxu0 }
 0x124   :  { %v244_v56 = vadd.f32 %v281_v50, %v243_v54 }
 0x126   :  { %246 = vst [vmem:[#allocation10 + $0x8] sm:$0xff] %v244_v56 }
 0x18f   :  { %v201_v57 = vpop.xlane.xlu0 %200 }
 0x190   :  { %284 = vrcp.f32 %v201_v57 }
 0x196   :  { %v285_v58 = vpop.eup %284 }
 0x197   :  { %v203_v59 = vmul.f32 %v285_v58, %v283_v47 }
 0x199   :  { %204 = vst [vmem:[#allocation10] sm:$0xff] %v203_v59 }
 0x19a   :  { %259 = dma.vmem_to_hbm [thread:$0]  %s255_s16, 512, %s257_s19, [#allocation4]  }
 0x19b   :  { %412 = dma.done.wait [#allocation4], 512  }
 0x19c   :  { %413 = vsyncadd [#allocation4], 4294966784 }
 0x19d   :  { %264 = vsyncpa [#allocation3], 1 }
 0x19e   :  { %265 = vsyncpa [#allocation6], 1 }
 0x19f   :  { %266 = vsyncpa [#allocation9], 1 }
 0x1a0   :  { %267 = vsyncpa [#allocation4], 1 }

</bundles_post_ra>
